<compile_context>
chip_gen: v5e
topology: v5e:2x2
jax: 0.10.0
libtpu: 0.0.40
codegen_flags: <defaults>
</compile_context>

<pallas_src>
import functools

import jax
import jax.numpy as jnp
from jax.experimental import pallas as pl
from jax.experimental.pallas import tpu as pltpu


def _hausdorff_er_kernel(pred_ref, target_ref, sum_ref, *, alpha, erosions, h, w_img, w_packed):
    # pred_ref / target_ref: (bt, H, Wp) where Wp = n_seg * w_img (n_seg images packed
    # along the lane axis).  sum_ref: (bt, 1, 1) f32 per-packed-row weighted sums.
    p = pred_ref[...].astype(jnp.float32)
    t = target_ref[...].astype(jnp.float32)
    bound = (p - t) ** 2                                   # (bt, H, Wp)
    bt = bound.shape[0]
    n_seg = w_packed // w_img

    # Edge masks, hoisted out of the erosion loop (JAX does not CSE broadcasts).
    # `col % w_img` marks every packed image's left/right boundary, which both supplies
    # the conv's zero padding and stops leakage between lane-packed images (and across
    # the cyclic roll wrap-around).
    col = jax.lax.broadcasted_iota(jnp.int32, (1, 1, w_packed), 2)
    row = jax.lax.broadcasted_iota(jnp.int32, (1, h, 1), 1)
    col_first = (col % w_img) == 0
    col_last = (col % w_img) == (w_img - 1)
    row_first = row == 0
    row_last = row == (h - 1)

    acc = jnp.zeros((bt, 1, 1), jnp.float32)               # per-row weighted sum
    # `erosions` is small & static (default 3) -> unrolled Python loop.
    # TODO(synk): for large `erosions` (e.g. 10+) switch to lax.fori_loop with a
    # (bound, acc) carry to bound vreg live ranges.
    for k in range(erosions):
        # 5-point cross stencil via in-vreg rolls + masks (no VMEM round trip).
        up = jnp.where(row_first, 0.0, pltpu.roll(bound, 1, 1))               # x[i-1, j]
        down = jnp.where(row_last, 0.0, pltpu.roll(bound, h - 1, 1))          # x[i+1, j]
        left = jnp.where(col_first, 0.0, pltpu.roll(bound, 1, 2))             # x[i, j-1]
        right = jnp.where(col_last, 0.0, pltpu.roll(bound, w_packed - 1, 2))  # x[i, j+1]

        dilation = 0.2 * (bound + up + down + left + right)
        erosion = jnp.maximum(dilation - 0.5, 0.0)

        # Per-image ptp normalization folded into per-image scale/offset scalars.
        # Reduce over rows once (shared by all lane segments), then per-segment lanes.
        cmin = jnp.min(erosion, axis=1, keepdims=True)     # (bt, 1, Wp)
        cmax = jnp.max(erosion, axis=1, keepdims=True)
        scales, offsets = [], []
        for s in range(n_seg):
            lo, hi = s * w_img, (s + 1) * w_img
            mn = jnp.min(cmin[:, :, lo:hi], axis=2, keepdims=True)   # (bt, 1, 1)
            mx = jnp.max(cmax[:, :, lo:hi], axis=2, keepdims=True)
            ptp = mx - mn
            has_range = ptp != 0.0
            inv = 1.0 / jnp.where(has_range, ptp, 1.0)      # exact divide; tiny operand
            off = jnp.where(has_range, mn * inv, 0.0)
            scales.append(jnp.broadcast_to(inv, (bt, 1, w_img)))
            offsets.append(jnp.broadcast_to(off, (bt, 1, w_img)))
        scale = scales[0] if n_seg == 1 else jnp.concatenate(scales, axis=-1)
        offset = offsets[0] if n_seg == 1 else jnp.concatenate(offsets, axis=-1)

        erosion = erosion * scale - offset                  # (erosion - mn)/ptp, guarded
        bound = erosion
        acc = acc + float((k + 1) ** alpha) * jnp.sum(erosion, axis=(1, 2), keepdims=True)

    sum_ref[...] = acc


def _num_tensorcores():
    # v7x has 2 TensorCores per chip; v5e/v6e have 1.  Detection failure defaults to 1
    # (single-core blocking is still correct on v7x, it just leaves one core idle).
    try:
        kind = jax.devices()[0].device_kind.lower()
    except Exception:
        return 1
    return 2 if ("v7" in kind or "7x" in kind) else 1


def hausdorff_er_loss(pred, target, alpha=2.0, erosions=3):
    """pred, target: (b, 1, H, W) binary maps (f32 / bf16 / int8). Returns scalar f32 loss."""
    assert pred.ndim == 4 and target.ndim == 4, "only the 2D (b,1,H,W) path is implemented"
    # TODO(synk): 3D (b,1,x,y,z) path with the (3,3,3)/7 kernel and debug=True
    # (returning intermediate erosion snapshots) are not implemented here.
    # TODO(synk): for very large images (H*W f32 blocks near v7x's 64 MiB VMEM) add
    # row-striping with halo carry instead of whole-image blocks.
    assert pred.shape == target.shape, "pred and target must have the same shape"
    B, C, H, W = pred.shape
    assert C == 1, "loss uses one binary channel"

    x = pred.reshape(B, H, W)
    y = target.reshape(B, H, W)

    # Lane packing factor: for W < 128, pack g images along the lane axis.
    g = max(1, min(128 // W, B)) if W < 128 else 1
    Wp = g * W
    rows_needed = -(-B // g)                       # ceil(B / g) packed rows

    # Batch-block size: target ~32K live f32 elements per block; keep >= 2 grid steps
    # only on multi-TensorCore chips so both cores get work.
    bt = max(1, 32768 // (H * Wp))
    if _num_tensorcores() > 1 and rows_needed >= 2:
        bt = min(bt, -(-rows_needed // 2))
    bt = max(1, min(bt, rows_needed))

    n_rows = -(-rows_needed // bt) * bt            # padded packed rows (multiple of bt)
    b_padded = n_rows * g
    if b_padded != B:
        # Zero-pad the batch: an all-zero image stays exactly zero through every erosion
        # iteration (ptp == 0 -> no normalization), so padded images contribute 0.
        pad = b_padded - B
        x = jnp.concatenate([x, jnp.zeros((pad, H, W), x.dtype)], axis=0)
        y = jnp.concatenate([y, jnp.zeros((pad, H, W), y.dtype)], axis=0)

    if g > 1:
        # Pack g images per row along the lane axis: row r, lanes [s*W,(s+1)*W) <-> image r*g+s.
        x = x.reshape(n_rows, g, H, W).transpose(0, 2, 1, 3).reshape(n_rows, H, Wp)
        y = y.reshape(n_rows, g, H, W).transpose(0, 2, 1, 3).reshape(n_rows, H, Wp)

    grid = (n_rows // bt,)
    kernel = functools.partial(
        _hausdorff_er_kernel,
        alpha=float(alpha), erosions=int(erosions), h=H, w_img=W, w_packed=Wp,
    )
    in_spec = pl.BlockSpec((bt, H, Wp), lambda b: (b, 0, 0))
    out_spec = pl.BlockSpec((bt, 1, 1), lambda b: (b, 0, 0))

    # VMEM budget from actual block sizes: 2 inputs x 2 pipeline buffers + f32 working set.
    in_block_bytes = bt * H * Wp * x.dtype.itemsize
    vmem_limit = int(min(112 << 20, max(32 << 20, 8 * in_block_bytes + (4 << 20))))

    row_sums = pl.pallas_call(
        kernel,
        out_shape=jax.ShapeDtypeStruct((n_rows, 1, 1), jnp.float32),
        grid=grid,
        in_specs=[in_spec, in_spec],
        out_specs=out_spec,
        compiler_params=pltpu.CompilerParams(
            dimension_semantics=("parallel",),
            vmem_limit_bytes=vmem_limit,
        ),
    )(x, y)

    # Finish the mean from the per-row partial sums (padded rows/images contribute 0).
    return jnp.sum(row_sums) / (B * C * H * W)


if __name__ == "__main__":
    key = jax.random.PRNGKey(0)
    k1, k2 = jax.random.split(key)
    B, C, H, W = 2, 1, 16, 16
    # Binary maps: 1 = foreground, 0 = background. bf16 halves HBM read traffic and is
    # exact for {0,1} masks; the kernel accumulates in f32.
    pred = (jax.random.uniform(k1, (B, C, H, W)) > 0.5).astype(jnp.bfloat16)
    target = (jax.random.uniform(k2, (B, C, H, W)) > 0.5).astype(jnp.bfloat16)

    loss = hausdorff_er_loss(pred, target, alpha=2.0, erosions=3)
    jax.block_until_ready(loss)
    print("KERNEL_OK")
</pallas_src>

<mosaic_0001>
module attributes {stable_mosaic.version = 11 : i64} {
  func.func @_hausdorff_er_kernel(%arg0: i32, %arg1: memref<1x16x32xbf16, #tpu.memory_space<vmem>>, %arg2: memref<1x16x32xbf16, #tpu.memory_space<vmem>>, %arg3: memref<1x1x1xf32, #tpu.memory_space<vmem>>) attributes {dimension_semantics = [#tpu.dimension_semantics<parallel>], iteration_bounds = array<i64: 1>, scalar_prefetch = 0 : i64, scratch_operands = 0 : i64, tpu.core_type = #tpu.core_type<tc>, window_params = [{transform_indices = @transform_0, window_bounds = array<i64: 1, 16, 32>}, {transform_indices = @transform_1, window_bounds = array<i64: 1, 16, 32>}, {transform_indices = @transform_2, window_bounds = array<i64: 1, 1, 1>}]} {
    %c0 = arith.constant 0 : index
    %c0_0 = arith.constant 0 : index
    %c0_1 = arith.constant 0 : index
    %0 = vector.load %arg1[%c0, %c0_0, %c0_1] : memref<1x16x32xbf16, #tpu.memory_space<vmem>>, vector<1x16x32xbf16>
    %1 = arith.extf %0 : vector<1x16x32xbf16> to vector<1x16x32xf32>
    %c0_2 = arith.constant 0 : index
    %c0_3 = arith.constant 0 : index
    %c0_4 = arith.constant 0 : index
    %2 = vector.load %arg2[%c0_2, %c0_3, %c0_4] : memref<1x16x32xbf16, #tpu.memory_space<vmem>>, vector<1x16x32xbf16>
    %3 = arith.extf %2 : vector<1x16x32xbf16> to vector<1x16x32xf32>
    %4 = arith.subf %1, %3 : vector<1x16x32xf32>
    %5 = arith.mulf %4, %4 : vector<1x16x32xf32>
    %6 = tpu.iota {dimensions = array<i32: 2>} : vector<1x1x32xi32>
    %7 = tpu.iota {dimensions = array<i32: 1>} : vector<1x16x1xi32>
    %c16_i32 = arith.constant 16 : i32
    %c0_i32 = arith.constant 0 : i32
    %8 = arith.cmpi eq, %c16_i32, %c0_i32 : i32
    %c1_i32 = arith.constant 1 : i32
    %9 = arith.select %8, %c1_i32, %c16_i32 : i32
    %10 = vector.broadcast %9 : i32 to vector<1x1x32xi32>
    %11 = arith.remsi %6, %10 : vector<1x1x32xi32>
    %c0_i32_5 = arith.constant 0 : i32
    %12 = vector.broadcast %c0_i32_5 : i32 to vector<1x1x32xi32>
    %13 = arith.cmpi ne, %11, %12 : vector<1x1x32xi32>
    %c0_i32_6 = arith.constant 0 : i32
    %14 = vector.broadcast %c0_i32_6 : i32 to vector<1x1x32xi32>
    %15 = arith.cmpi slt, %11, %14 : vector<1x1x32xi32>
    %c0_i32_7 = arith.constant 0 : i32
    %16 = arith.cmpi slt, %9, %c0_i32_7 : i32
    %17 = vector.broadcast %16 : i1 to vector<1x1x32xi1>
    %18 = vector.broadcast %17 : vector<1x1x32xi1> to vector<1x1x32xi1>
    %19 = arith.xori %15, %18 : vector<1x1x32xi1>
    %20 = arith.andi %19, %13 : vector<1x1x32xi1>
    %21 = vector.broadcast %9 : i32 to vector<1x1x32xi32>
    %22 = arith.addi %11, %21 : vector<1x1x32xi32>
    %23 = arith.select %20, %22, %11 : vector<1x1x32xi1>, vector<1x1x32xi32>
    %c0_i32_8 = arith.constant 0 : i32
    %24 = vector.broadcast %c0_i32_8 : i32 to vector<1x1x32xi32>
    %25 = arith.cmpi eq, %23, %24 : vector<1x1x32xi32>
    %c16_i32_9 = arith.constant 16 : i32
    %c0_i32_10 = arith.constant 0 : i32
    %26 = arith.cmpi eq, %c16_i32_9, %c0_i32_10 : i32
    %c1_i32_11 = arith.constant 1 : i32
    %27 = arith.select %26, %c1_i32_11, %c16_i32_9 : i32
    %28 = vector.broadcast %27 : i32 to vector<1x1x32xi32>
    %29 = arith.remsi %6, %28 : vector<1x1x32xi32>
    %c0_i32_12 = arith.constant 0 : i32
    %30 = vector.broadcast %c0_i32_12 : i32 to vector<1x1x32xi32>
    %31 = arith.cmpi ne, %29, %30 : vector<1x1x32xi32>
    %c0_i32_13 = arith.constant 0 : i32
    %32 = vector.broadcast %c0_i32_13 : i32 to vector<1x1x32xi32>
    %33 = arith.cmpi slt, %29, %32 : vector<1x1x32xi32>
    %c0_i32_14 = arith.constant 0 : i32
    %34 = arith.cmpi slt, %27, %c0_i32_14 : i32
    %35 = vector.broadcast %34 : i1 to vector<1x1x32xi1>
    %36 = vector.broadcast %35 : vector<1x1x32xi1> to vector<1x1x32xi1>
    %37 = arith.xori %33, %36 : vector<1x1x32xi1>
    %38 = arith.andi %37, %31 : vector<1x1x32xi1>
    %39 = vector.broadcast %27 : i32 to vector<1x1x32xi32>
    %40 = arith.addi %29, %39 : vector<1x1x32xi32>
    %41 = arith.select %38, %40, %29 : vector<1x1x32xi1>, vector<1x1x32xi32>
    %c15_i32 = arith.constant 15 : i32
    %42 = vector.broadcast %c15_i32 : i32 to vector<1x1x32xi32>
    %43 = arith.cmpi eq, %41, %42 : vector<1x1x32xi32>
    %c0_i32_15 = arith.constant 0 : i32
    %44 = vector.broadcast %c0_i32_15 : i32 to vector<1x16x1xi32>
    %45 = arith.cmpi eq, %7, %44 : vector<1x16x1xi32>
    %c15_i32_16 = arith.constant 15 : i32
    %46 = vector.broadcast %c15_i32_16 : i32 to vector<1x16x1xi32>
    %47 = arith.cmpi eq, %7, %46 : vector<1x16x1xi32>
    %cst = arith.constant 0.000000e+00 : f32
    %48 = vector.broadcast %cst : f32 to vector<1x1x1xf32>
    %c1_i32_17 = arith.constant 1 : i32
    %49 = tpu.dynamic_rotate %5 by %c1_i32_17 dim 1 : vector<1x16x32xf32>, i32 -> vector<1x16x32xf32>
    %cst_18 = arith.constant 0.000000e+00 : f32
    %50 = vector.shape_cast %45 : vector<1x16x1xi1> to vector<1x16x1xi1>
    %51 = vector.broadcast %50 : vector<1x16x1xi1> to vector<1x16x32xi1>
    %52 = vector.broadcast %cst_18 : f32 to vector<1x16x32xf32>
    %53 = arith.select %51, %52, %49 : vector<1x16x32xi1>, vector<1x16x32xf32>
    %c15_i32_19 = arith.constant 15 : i32
    %54 = tpu.dynamic_rotate %5 by %c15_i32_19 dim 1 : vector<1x16x32xf32>, i32 -> vector<1x16x32xf32>
    %cst_20 = arith.constant 0.000000e+00 : f32
    %55 = vector.shape_cast %47 : vector<1x16x1xi1> to vector<1x16x1xi1>
    %56 = vector.broadcast %55 : vector<1x16x1xi1> to vector<1x16x32xi1>
    %57 = vector.broadcast %cst_20 : f32 to vector<1x16x32xf32>
    %58 = arith.select %56, %57, %54 : vector<1x16x32xi1>, vector<1x16x32xf32>
    %c1_i32_21 = arith.constant 1 : i32
    %59 = tpu.dynamic_rotate %5 by %c1_i32_21 dim 2 : vector<1x16x32xf32>, i32 -> vector<1x16x32xf32>
    %cst_22 = arith.constant 0.000000e+00 : f32
    %60 = vector.shape_cast %25 : vector<1x1x32xi1> to vector<1x1x32xi1>
    %61 = vector.broadcast %60 : vector<1x1x32xi1> to vector<1x16x32xi1>
    %62 = vector.broadcast %cst_22 : f32 to vector<1x16x32xf32>
    %63 = arith.select %61, %62, %59 : vector<1x16x32xi1>, vector<1x16x32xf32>
    %c31_i32 = arith.constant 31 : i32
    %64 = tpu.dynamic_rotate %5 by %c31_i32 dim 2 : vector<1x16x32xf32>, i32 -> vector<1x16x32xf32>
    %cst_23 = arith.constant 0.000000e+00 : f32
    %65 = vector.shape_cast %43 : vector<1x1x32xi1> to vector<1x1x32xi1>
    %66 = vector.broadcast %65 : vector<1x1x32xi1> to vector<1x16x32xi1>
    %67 = vector.broadcast %cst_23 : f32 to vector<1x16x32xf32>
    %68 = arith.select %66, %67, %64 : vector<1x16x32xi1>, vector<1x16x32xf32>
    %69 = arith.addf %5, %53 : vector<1x16x32xf32>
    %70 = arith.addf %69, %58 : vector<1x16x32xf32>
    %71 = arith.addf %70, %63 : vector<1x16x32xf32>
    %72 = arith.addf %71, %68 : vector<1x16x32xf32>
    %cst_24 = arith.constant 2.000000e-01 : f32
    %73 = vector.broadcast %cst_24 : f32 to vector<1x16x32xf32>
    %74 = arith.mulf %73, %72 : vector<1x16x32xf32>
    %cst_25 = arith.constant 5.000000e-01 : f32
    %75 = vector.broadcast %cst_25 : f32 to vector<1x16x32xf32>
    %76 = arith.subf %74, %75 : vector<1x16x32xf32>
    %cst_26 = arith.constant 0.000000e+00 : f32
    %77 = vector.broadcast %cst_26 : f32 to vector<1x16x32xf32>
    %78 = arith.maximumf %76, %77 : vector<1x16x32xf32>
    %cst_27 = arith.constant dense<0x7F800000> : vector<1x32xf32>
    %79 = vector.multi_reduction <minimumf>, %78, %cst_27 [1] : vector<1x16x32xf32> to vector<1x32xf32>
    %80 = vector.shape_cast %79 : vector<1x32xf32> to vector<1x1x32xf32>
    %cst_28 = arith.constant dense<0xFF800000> : vector<1x32xf32>
    %81 = vector.multi_reduction <maximumf>, %78, %cst_28 [1] : vector<1x16x32xf32> to vector<1x32xf32>
    %82 = vector.shape_cast %81 : vector<1x32xf32> to vector<1x1x32xf32>
    %83 = vector.extract_strided_slice %80 {offsets = [0, 0, 0], sizes = [1, 1, 16], strides = [1, 1, 1]} : vector<1x1x32xf32> to vector<1x1x16xf32>
    %cst_29 = arith.constant dense<0x7F800000> : vector<1x1xf32>
    %84 = vector.multi_reduction <minimumf>, %83, %cst_29 [2] : vector<1x1x16xf32> to vector<1x1xf32>
    %85 = vector.shape_cast %84 : vector<1x1xf32> to vector<1x1x1xf32>
    %86 = vector.extract_strided_slice %82 {offsets = [0, 0, 0], sizes = [1, 1, 16], strides = [1, 1, 1]} : vector<1x1x32xf32> to vector<1x1x16xf32>
    %cst_30 = arith.constant dense<0xFF800000> : vector<1x1xf32>
    %87 = vector.multi_reduction <maximumf>, %86, %cst_30 [2] : vector<1x1x16xf32> to vector<1x1xf32>
    %88 = vector.shape_cast %87 : vector<1x1xf32> to vector<1x1x1xf32>
    %89 = arith.subf %88, %85 : vector<1x1x1xf32>
    %cst_31 = arith.constant 0.000000e+00 : f32
    %90 = vector.broadcast %cst_31 : f32 to vector<1x1x1xf32>
    %91 = arith.cmpf one, %89, %90 : vector<1x1x1xf32>
    %cst_32 = arith.constant 1.000000e+00 : f32
    %92 = vector.broadcast %cst_32 : f32 to vector<1x1x1xf32>
    %93 = arith.select %91, %89, %92 : vector<1x1x1xi1>, vector<1x1x1xf32>
    %cst_33 = arith.constant 1.000000e+00 : f32
    %94 = vector.broadcast %cst_33 : f32 to vector<1x1x1xf32>
    %95 = arith.divf %94, %93 : vector<1x1x1xf32>
    %96 = arith.mulf %85, %95 : vector<1x1x1xf32>
    %cst_34 = arith.constant 0.000000e+00 : f32
    %97 = vector.broadcast %cst_34 : f32 to vector<1x1x1xf32>
    %98 = arith.select %91, %96, %97 : vector<1x1x1xi1>, vector<1x1x1xf32>
    %99 = vector.shape_cast %95 : vector<1x1x1xf32> to vector<1x1x1xf32>
    %100 = vector.broadcast %99 : vector<1x1x1xf32> to vector<1x1x16xf32>
    %101 = vector.shape_cast %98 : vector<1x1x1xf32> to vector<1x1x1xf32>
    %102 = vector.broadcast %101 : vector<1x1x1xf32> to vector<1x1x16xf32>
    %103 = vector.extract_strided_slice %80 {offsets = [0, 0, 16], sizes = [1, 1, 16], strides = [1, 1, 1]} : vector<1x1x32xf32> to vector<1x1x16xf32>
    %cst_35 = arith.constant dense<0x7F800000> : vector<1x1xf32>
    %104 = vector.multi_reduction <minimumf>, %103, %cst_35 [2] : vector<1x1x16xf32> to vector<1x1xf32>
    %105 = vector.shape_cast %104 : vector<1x1xf32> to vector<1x1x1xf32>
    %106 = vector.extract_strided_slice %82 {offsets = [0, 0, 16], sizes = [1, 1, 16], strides = [1, 1, 1]} : vector<1x1x32xf32> to vector<1x1x16xf32>
    %cst_36 = arith.constant dense<0xFF800000> : vector<1x1xf32>
    %107 = vector.multi_reduction <maximumf>, %106, %cst_36 [2] : vector<1x1x16xf32> to vector<1x1xf32>
    %108 = vector.shape_cast %107 : vector<1x1xf32> to vector<1x1x1xf32>
    %109 = arith.subf %108, %105 : vector<1x1x1xf32>
    %cst_37 = arith.constant 0.000000e+00 : f32
    %110 = vector.broadcast %cst_37 : f32 to vector<1x1x1xf32>
    %111 = arith.cmpf one, %109, %110 : vector<1x1x1xf32>
    %cst_38 = arith.constant 1.000000e+00 : f32
    %112 = vector.broadcast %cst_38 : f32 to vector<1x1x1xf32>
    %113 = arith.select %111, %109, %112 : vector<1x1x1xi1>, vector<1x1x1xf32>
    %cst_39 = arith.constant 1.000000e+00 : f32
    %114 = vector.broadcast %cst_39 : f32 to vector<1x1x1xf32>
    %115 = arith.divf %114, %113 : vector<1x1x1xf32>
    %116 = arith.mulf %105, %115 : vector<1x1x1xf32>
    %cst_40 = arith.constant 0.000000e+00 : f32
    %117 = vector.broadcast %cst_40 : f32 to vector<1x1x1xf32>
    %118 = arith.select %111, %116, %117 : vector<1x1x1xi1>, vector<1x1x1xf32>
    %119 = vector.shape_cast %115 : vector<1x1x1xf32> to vector<1x1x1xf32>
    %120 = vector.broadcast %119 : vector<1x1x1xf32> to vector<1x1x16xf32>
    %121 = vector.shape_cast %118 : vector<1x1x1xf32> to vector<1x1x1xf32>
    %122 = vector.broadcast %121 : vector<1x1x1xf32> to vector<1x1x16xf32>
    %123 = tpu.concatenate %100, %120 in 2 : vector<1x1x16xf32>, vector<1x1x16xf32> -> vector<1x1x32xf32>
    %124 = tpu.concatenate %102, %122 in 2 : vector<1x1x16xf32>, vector<1x1x16xf32> -> vector<1x1x32xf32>
    %125 = vector.broadcast %123 : vector<1x1x32xf32> to vector<1x16x32xf32>
    %126 = arith.mulf %78, %125 : vector<1x16x32xf32>
    %127 = vector.broadcast %124 : vector<1x1x32xf32> to vector<1x16x32xf32>
    %128 = arith.subf %126, %127 : vector<1x16x32xf32>
    %cst_41 = arith.constant dense<0.000000e+00> : vector<1xf32>
    %129 = vector.multi_reduction <add>, %128, %cst_41 [1, 2] : vector<1x16x32xf32> to vector<1xf32>
    %130 = vector.shape_cast %129 : vector<1xf32> to vector<1x1x1xf32>
    %cst_42 = arith.constant 1.000000e+00 : f32
    %131 = vector.broadcast %cst_42 : f32 to vector<1x1x1xf32>
    %132 = arith.mulf %131, %130 : vector<1x1x1xf32>
    %133 = arith.addf %48, %132 : vector<1x1x1xf32>
    %c1_i32_43 = arith.constant 1 : i32
    %134 = tpu.dynamic_rotate %128 by %c1_i32_43 dim 1 : vector<1x16x32xf32>, i32 -> vector<1x16x32xf32>
    %cst_44 = arith.constant 0.000000e+00 : f32
    %135 = vector.shape_cast %45 : vector<1x16x1xi1> to vector<1x16x1xi1>
    %136 = vector.broadcast %135 : vector<1x16x1xi1> to vector<1x16x32xi1>
    %137 = vector.broadcast %cst_44 : f32 to vector<1x16x32xf32>
    %138 = arith.select %136, %137, %134 : vector<1x16x32xi1>, vector<1x16x32xf32>
    %c15_i32_45 = arith.constant 15 : i32
    %139 = tpu.dynamic_rotate %128 by %c15_i32_45 dim 1 : vector<1x16x32xf32>, i32 -> vector<1x16x32xf32>
    %cst_46 = arith.constant 0.000000e+00 : f32
    %140 = vector.shape_cast %47 : vector<1x16x1xi1> to vector<1x16x1xi1>
    %141 = vector.broadcast %140 : vector<1x16x1xi1> to vector<1x16x32xi1>
    %142 = vector.broadcast %cst_46 : f32 to vector<1x16x32xf32>
    %143 = arith.select %141, %142, %139 : vector<1x16x32xi1>, vector<1x16x32xf32>
    %c1_i32_47 = arith.constant 1 : i32
    %144 = tpu.dynamic_rotate %128 by %c1_i32_47 dim 2 : vector<1x16x32xf32>, i32 -> vector<1x16x32xf32>
    %cst_48 = arith.constant 0.000000e+00 : f32
    %145 = vector.shape_cast %25 : vector<1x1x32xi1> to vector<1x1x32xi1>
    %146 = vector.broadcast %145 : vector<1x1x32xi1> to vector<1x16x32xi1>
    %147 = vector.broadcast %cst_48 : f32 to vector<1x16x32xf32>
    %148 = arith.select %146, %147, %144 : vector<1x16x32xi1>, vector<1x16x32xf32>
    %c31_i32_49 = arith.constant 31 : i32
    %149 = tpu.dynamic_rotate %128 by %c31_i32_49 dim 2 : vector<1x16x32xf32>, i32 -> vector<1x16x32xf32>
    %cst_50 = arith.constant 0.000000e+00 : f32
    %150 = vector.shape_cast %43 : vector<1x1x32xi1> to vector<1x1x32xi1>
    %151 = vector.broadcast %150 : vector<1x1x32xi1> to vector<1x16x32xi1>
    %152 = vector.broadcast %cst_50 : f32 to vector<1x16x32xf32>
    %153 = arith.select %151, %152, %149 : vector<1x16x32xi1>, vector<1x16x32xf32>
    %154 = arith.addf %128, %138 : vector<1x16x32xf32>
    %155 = arith.addf %154, %143 : vector<1x16x32xf32>
    %156 = arith.addf %155, %148 : vector<1x16x32xf32>
    %157 = arith.addf %156, %153 : vector<1x16x32xf32>
    %cst_51 = arith.constant 2.000000e-01 : f32
    %158 = vector.broadcast %cst_51 : f32 to vector<1x16x32xf32>
    %159 = arith.mulf %158, %157 : vector<1x16x32xf32>
    %cst_52 = arith.constant 5.000000e-01 : f32
    %160 = vector.broadcast %cst_52 : f32 to vector<1x16x32xf32>
    %161 = arith.subf %159, %160 : vector<1x16x32xf32>
    %cst_53 = arith.constant 0.000000e+00 : f32
    %162 = vector.broadcast %cst_53 : f32 to vector<1x16x32xf32>
    %163 = arith.maximumf %161, %162 : vector<1x16x32xf32>
    %cst_54 = arith.constant dense<0x7F800000> : vector<1x32xf32>
    %164 = vector.multi_reduction <minimumf>, %163, %cst_54 [1] : vector<1x16x32xf32> to vector<1x32xf32>
    %165 = vector.shape_cast %164 : vector<1x32xf32> to vector<1x1x32xf32>
    %cst_55 = arith.constant dense<0xFF800000> : vector<1x32xf32>
    %166 = vector.multi_reduction <maximumf>, %163, %cst_55 [1] : vector<1x16x32xf32> to vector<1x32xf32>
    %167 = vector.shape_cast %166 : vector<1x32xf32> to vector<1x1x32xf32>
    %168 = vector.extract_strided_slice %165 {offsets = [0, 0, 0], sizes = [1, 1, 16], strides = [1, 1, 1]} : vector<1x1x32xf32> to vector<1x1x16xf32>
    %cst_56 = arith.constant dense<0x7F800000> : vector<1x1xf32>
    %169 = vector.multi_reduction <minimumf>, %168, %cst_56 [2] : vector<1x1x16xf32> to vector<1x1xf32>
    %170 = vector.shape_cast %169 : vector<1x1xf32> to vector<1x1x1xf32>
    %171 = vector.extract_strided_slice %167 {offsets = [0, 0, 0], sizes = [1, 1, 16], strides = [1, 1, 1]} : vector<1x1x32xf32> to vector<1x1x16xf32>
    %cst_57 = arith.constant dense<0xFF800000> : vector<1x1xf32>
    %172 = vector.multi_reduction <maximumf>, %171, %cst_57 [2] : vector<1x1x16xf32> to vector<1x1xf32>
    %173 = vector.shape_cast %172 : vector<1x1xf32> to vector<1x1x1xf32>
    %174 = arith.subf %173, %170 : vector<1x1x1xf32>
    %cst_58 = arith.constant 0.000000e+00 : f32
    %175 = vector.broadcast %cst_58 : f32 to vector<1x1x1xf32>
    %176 = arith.cmpf one, %174, %175 : vector<1x1x1xf32>
    %cst_59 = arith.constant 1.000000e+00 : f32
    %177 = vector.broadcast %cst_59 : f32 to vector<1x1x1xf32>
    %178 = arith.select %176, %174, %177 : vector<1x1x1xi1>, vector<1x1x1xf32>
    %cst_60 = arith.constant 1.000000e+00 : f32
    %179 = vector.broadcast %cst_60 : f32 to vector<1x1x1xf32>
    %180 = arith.divf %179, %178 : vector<1x1x1xf32>
    %181 = arith.mulf %170, %180 : vector<1x1x1xf32>
    %cst_61 = arith.constant 0.000000e+00 : f32
    %182 = vector.broadcast %cst_61 : f32 to vector<1x1x1xf32>
    %183 = arith.select %176, %181, %182 : vector<1x1x1xi1>, vector<1x1x1xf32>
    %184 = vector.shape_cast %180 : vector<1x1x1xf32> to vector<1x1x1xf32>
    %185 = vector.broadcast %184 : vector<1x1x1xf32> to vector<1x1x16xf32>
    %186 = vector.shape_cast %183 : vector<1x1x1xf32> to vector<1x1x1xf32>
    %187 = vector.broadcast %186 : vector<1x1x1xf32> to vector<1x1x16xf32>
    %188 = vector.extract_strided_slice %165 {offsets = [0, 0, 16], sizes = [1, 1, 16], strides = [1, 1, 1]} : vector<1x1x32xf32> to vector<1x1x16xf32>
    %cst_62 = arith.constant dense<0x7F800000> : vector<1x1xf32>
    %189 = vector.multi_reduction <minimumf>, %188, %cst_62 [2] : vector<1x1x16xf32> to vector<1x1xf32>
    %190 = vector.shape_cast %189 : vector<1x1xf32> to vector<1x1x1xf32>
    %191 = vector.extract_strided_slice %167 {offsets = [0, 0, 16], sizes = [1, 1, 16], strides = [1, 1, 1]} : vector<1x1x32xf32> to vector<1x1x16xf32>
    %cst_63 = arith.constant dense<0xFF800000> : vector<1x1xf32>
    %192 = vector.multi_reduction <maximumf>, %191, %cst_63 [2] : vector<1x1x16xf32> to vector<1x1xf32>
    %193 = vector.shape_cast %192 : vector<1x1xf32> to vector<1x1x1xf32>
    %194 = arith.subf %193, %190 : vector<1x1x1xf32>
    %cst_64 = arith.constant 0.000000e+00 : f32
    %195 = vector.broadcast %cst_64 : f32 to vector<1x1x1xf32>
    %196 = arith.cmpf one, %194, %195 : vector<1x1x1xf32>
    %cst_65 = arith.constant 1.000000e+00 : f32
    %197 = vector.broadcast %cst_65 : f32 to vector<1x1x1xf32>
    %198 = arith.select %196, %194, %197 : vector<1x1x1xi1>, vector<1x1x1xf32>
    %cst_66 = arith.constant 1.000000e+00 : f32
    %199 = vector.broadcast %cst_66 : f32 to vector<1x1x1xf32>
    %200 = arith.divf %199, %198 : vector<1x1x1xf32>
    %201 = arith.mulf %190, %200 : vector<1x1x1xf32>
    %cst_67 = arith.constant 0.000000e+00 : f32
    %202 = vector.broadcast %cst_67 : f32 to vector<1x1x1xf32>
    %203 = arith.select %196, %201, %202 : vector<1x1x1xi1>, vector<1x1x1xf32>
    %204 = vector.shape_cast %200 : vector<1x1x1xf32> to vector<1x1x1xf32>
    %205 = vector.broadcast %204 : vector<1x1x1xf32> to vector<1x1x16xf32>
    %206 = vector.shape_cast %203 : vector<1x1x1xf32> to vector<1x1x1xf32>
    %207 = vector.broadcast %206 : vector<1x1x1xf32> to vector<1x1x16xf32>
    %208 = tpu.concatenate %185, %205 in 2 : vector<1x1x16xf32>, vector<1x1x16xf32> -> vector<1x1x32xf32>
    %209 = tpu.concatenate %187, %207 in 2 : vector<1x1x16xf32>, vector<1x1x16xf32> -> vector<1x1x32xf32>
    %210 = vector.broadcast %208 : vector<1x1x32xf32> to vector<1x16x32xf32>
    %211 = arith.mulf %163, %210 : vector<1x16x32xf32>
    %212 = vector.broadcast %209 : vector<1x1x32xf32> to vector<1x16x32xf32>
    %213 = arith.subf %211, %212 : vector<1x16x32xf32>
    %cst_68 = arith.constant dense<0.000000e+00> : vector<1xf32>
    %214 = vector.multi_reduction <add>, %213, %cst_68 [1, 2] : vector<1x16x32xf32> to vector<1xf32>
    %215 = vector.shape_cast %214 : vector<1xf32> to vector<1x1x1xf32>
    %cst_69 = arith.constant 4.000000e+00 : f32
    %216 = vector.broadcast %cst_69 : f32 to vector<1x1x1xf32>
    %217 = arith.mulf %216, %215 : vector<1x1x1xf32>
    %218 = arith.addf %133, %217 : vector<1x1x1xf32>
    %c1_i32_70 = arith.constant 1 : i32
    %219 = tpu.dynamic_rotate %213 by %c1_i32_70 dim 1 : vector<1x16x32xf32>, i32 -> vector<1x16x32xf32>
    %cst_71 = arith.constant 0.000000e+00 : f32
    %220 = vector.shape_cast %45 : vector<1x16x1xi1> to vector<1x16x1xi1>
    %221 = vector.broadcast %220 : vector<1x16x1xi1> to vector<1x16x32xi1>
    %222 = vector.broadcast %cst_71 : f32 to vector<1x16x32xf32>
    %223 = arith.select %221, %222, %219 : vector<1x16x32xi1>, vector<1x16x32xf32>
    %c15_i32_72 = arith.constant 15 : i32
    %224 = tpu.dynamic_rotate %213 by %c15_i32_72 dim 1 : vector<1x16x32xf32>, i32 -> vector<1x16x32xf32>
    %cst_73 = arith.constant 0.000000e+00 : f32
    %225 = vector.shape_cast %47 : vector<1x16x1xi1> to vector<1x16x1xi1>
    %226 = vector.broadcast %225 : vector<1x16x1xi1> to vector<1x16x32xi1>
    %227 = vector.broadcast %cst_73 : f32 to vector<1x16x32xf32>
    %228 = arith.select %226, %227, %224 : vector<1x16x32xi1>, vector<1x16x32xf32>
    %c1_i32_74 = arith.constant 1 : i32
    %229 = tpu.dynamic_rotate %213 by %c1_i32_74 dim 2 : vector<1x16x32xf32>, i32 -> vector<1x16x32xf32>
    %cst_75 = arith.constant 0.000000e+00 : f32
    %230 = vector.shape_cast %25 : vector<1x1x32xi1> to vector<1x1x32xi1>
    %231 = vector.broadcast %230 : vector<1x1x32xi1> to vector<1x16x32xi1>
    %232 = vector.broadcast %cst_75 : f32 to vector<1x16x32xf32>
    %233 = arith.select %231, %232, %229 : vector<1x16x32xi1>, vector<1x16x32xf32>
    %c31_i32_76 = arith.constant 31 : i32
    %234 = tpu.dynamic_rotate %213 by %c31_i32_76 dim 2 : vector<1x16x32xf32>, i32 -> vector<1x16x32xf32>
    %cst_77 = arith.constant 0.000000e+00 : f32
    %235 = vector.shape_cast %43 : vector<1x1x32xi1> to vector<1x1x32xi1>
    %236 = vector.broadcast %235 : vector<1x1x32xi1> to vector<1x16x32xi1>
    %237 = vector.broadcast %cst_77 : f32 to vector<1x16x32xf32>
    %238 = arith.select %236, %237, %234 : vector<1x16x32xi1>, vector<1x16x32xf32>
    %239 = arith.addf %213, %223 : vector<1x16x32xf32>
    %240 = arith.addf %239, %228 : vector<1x16x32xf32>
    %241 = arith.addf %240, %233 : vector<1x16x32xf32>
    %242 = arith.addf %241, %238 : vector<1x16x32xf32>
    %cst_78 = arith.constant 2.000000e-01 : f32
    %243 = vector.broadcast %cst_78 : f32 to vector<1x16x32xf32>
    %244 = arith.mulf %243, %242 : vector<1x16x32xf32>
    %cst_79 = arith.constant 5.000000e-01 : f32
    %245 = vector.broadcast %cst_79 : f32 to vector<1x16x32xf32>
    %246 = arith.subf %244, %245 : vector<1x16x32xf32>
    %cst_80 = arith.constant 0.000000e+00 : f32
    %247 = vector.broadcast %cst_80 : f32 to vector<1x16x32xf32>
    %248 = arith.maximumf %246, %247 : vector<1x16x32xf32>
    %cst_81 = arith.constant dense<0x7F800000> : vector<1x32xf32>
    %249 = vector.multi_reduction <minimumf>, %248, %cst_81 [1] : vector<1x16x32xf32> to vector<1x32xf32>
    %250 = vector.shape_cast %249 : vector<1x32xf32> to vector<1x1x32xf32>
    %cst_82 = arith.constant dense<0xFF800000> : vector<1x32xf32>
    %251 = vector.multi_reduction <maximumf>, %248, %cst_82 [1] : vector<1x16x32xf32> to vector<1x32xf32>
    %252 = vector.shape_cast %251 : vector<1x32xf32> to vector<1x1x32xf32>
    %253 = vector.extract_strided_slice %250 {offsets = [0, 0, 0], sizes = [1, 1, 16], strides = [1, 1, 1]} : vector<1x1x32xf32> to vector<1x1x16xf32>
    %cst_83 = arith.constant dense<0x7F800000> : vector<1x1xf32>
    %254 = vector.multi_reduction <minimumf>, %253, %cst_83 [2] : vector<1x1x16xf32> to vector<1x1xf32>
    %255 = vector.shape_cast %254 : vector<1x1xf32> to vector<1x1x1xf32>
    %256 = vector.extract_strided_slice %252 {offsets = [0, 0, 0], sizes = [1, 1, 16], strides = [1, 1, 1]} : vector<1x1x32xf32> to vector<1x1x16xf32>
    %cst_84 = arith.constant dense<0xFF800000> : vector<1x1xf32>
    %257 = vector.multi_reduction <maximumf>, %256, %cst_84 [2] : vector<1x1x16xf32> to vector<1x1xf32>
    %258 = vector.shape_cast %257 : vector<1x1xf32> to vector<1x1x1xf32>
    %259 = arith.subf %258, %255 : vector<1x1x1xf32>
    %cst_85 = arith.constant 0.000000e+00 : f32
    %260 = vector.broadcast %cst_85 : f32 to vector<1x1x1xf32>
    %261 = arith.cmpf one, %259, %260 : vector<1x1x1xf32>
    %cst_86 = arith.constant 1.000000e+00 : f32
    %262 = vector.broadcast %cst_86 : f32 to vector<1x1x1xf32>
    %263 = arith.select %261, %259, %262 : vector<1x1x1xi1>, vector<1x1x1xf32>
    %cst_87 = arith.constant 1.000000e+00 : f32
    %264 = vector.broadcast %cst_87 : f32 to vector<1x1x1xf32>
    %265 = arith.divf %264, %263 : vector<1x1x1xf32>
    %266 = arith.mulf %255, %265 : vector<1x1x1xf32>
    %cst_88 = arith.constant 0.000000e+00 : f32
    %267 = vector.broadcast %cst_88 : f32 to vector<1x1x1xf32>
    %268 = arith.select %261, %266, %267 : vector<1x1x1xi1>, vector<1x1x1xf32>
    %269 = vector.shape_cast %265 : vector<1x1x1xf32> to vector<1x1x1xf32>
    %270 = vector.broadcast %269 : vector<1x1x1xf32> to vector<1x1x16xf32>
    %271 = vector.shape_cast %268 : vector<1x1x1xf32> to vector<1x1x1xf32>
    %272 = vector.broadcast %271 : vector<1x1x1xf32> to vector<1x1x16xf32>
    %273 = vector.extract_strided_slice %250 {offsets = [0, 0, 16], sizes = [1, 1, 16], strides = [1, 1, 1]} : vector<1x1x32xf32> to vector<1x1x16xf32>
    %cst_89 = arith.constant dense<0x7F800000> : vector<1x1xf32>
    %274 = vector.multi_reduction <minimumf>, %273, %cst_89 [2] : vector<1x1x16xf32> to vector<1x1xf32>
    %275 = vector.shape_cast %274 : vector<1x1xf32> to vector<1x1x1xf32>
    %276 = vector.extract_strided_slice %252 {offsets = [0, 0, 16], sizes = [1, 1, 16], strides = [1, 1, 1]} : vector<1x1x32xf32> to vector<1x1x16xf32>
    %cst_90 = arith.constant dense<0xFF800000> : vector<1x1xf32>
    %277 = vector.multi_reduction <maximumf>, %276, %cst_90 [2] : vector<1x1x16xf32> to vector<1x1xf32>
    %278 = vector.shape_cast %277 : vector<1x1xf32> to vector<1x1x1xf32>
    %279 = arith.subf %278, %275 : vector<1x1x1xf32>
    %cst_91 = arith.constant 0.000000e+00 : f32
    %280 = vector.broadcast %cst_91 : f32 to vector<1x1x1xf32>
    %281 = arith.cmpf one, %279, %280 : vector<1x1x1xf32>
    %cst_92 = arith.constant 1.000000e+00 : f32
    %282 = vector.broadcast %cst_92 : f32 to vector<1x1x1xf32>
    %283 = arith.select %281, %279, %282 : vector<1x1x1xi1>, vector<1x1x1xf32>
    %cst_93 = arith.constant 1.000000e+00 : f32
    %284 = vector.broadcast %cst_93 : f32 to vector<1x1x1xf32>
    %285 = arith.divf %284, %283 : vector<1x1x1xf32>
    %286 = arith.mulf %275, %285 : vector<1x1x1xf32>
    %cst_94 = arith.constant 0.000000e+00 : f32
    %287 = vector.broadcast %cst_94 : f32 to vector<1x1x1xf32>
    %288 = arith.select %281, %286, %287 : vector<1x1x1xi1>, vector<1x1x1xf32>
    %289 = vector.shape_cast %285 : vector<1x1x1xf32> to vector<1x1x1xf32>
    %290 = vector.broadcast %289 : vector<1x1x1xf32> to vector<1x1x16xf32>
    %291 = vector.shape_cast %288 : vector<1x1x1xf32> to vector<1x1x1xf32>
    %292 = vector.broadcast %291 : vector<1x1x1xf32> to vector<1x1x16xf32>
    %293 = tpu.concatenate %270, %290 in 2 : vector<1x1x16xf32>, vector<1x1x16xf32> -> vector<1x1x32xf32>
    %294 = tpu.concatenate %272, %292 in 2 : vector<1x1x16xf32>, vector<1x1x16xf32> -> vector<1x1x32xf32>
    %295 = vector.broadcast %293 : vector<1x1x32xf32> to vector<1x16x32xf32>
    %296 = arith.mulf %248, %295 : vector<1x16x32xf32>
    %297 = vector.broadcast %294 : vector<1x1x32xf32> to vector<1x16x32xf32>
    %298 = arith.subf %296, %297 : vector<1x16x32xf32>
    %cst_95 = arith.constant dense<0.000000e+00> : vector<1xf32>
    %299 = vector.multi_reduction <add>, %298, %cst_95 [1, 2] : vector<1x16x32xf32> to vector<1xf32>
    %300 = vector.shape_cast %299 : vector<1xf32> to vector<1x1x1xf32>
    %cst_96 = arith.constant 9.000000e+00 : f32
    %301 = vector.broadcast %cst_96 : f32 to vector<1x1x1xf32>
    %302 = arith.mulf %301, %300 : vector<1x1x1xf32>
    %303 = arith.addf %218, %302 : vector<1x1x1xf32>
    %c0_97 = arith.constant 0 : index
    %c0_98 = arith.constant 0 : index
    %c0_99 = arith.constant 0 : index
    %304 = vector.load %arg3[%c0_97, %c0_98, %c0_99] : memref<1x1x1xf32, #tpu.memory_space<vmem>>, vector<1x1x1xf32>
    tpu.vector_store %arg3[%c0_97, %c0_98, %c0_99], %303 {strides = array<i32>} : memref<1x1x1xf32, #tpu.memory_space<vmem>>, vector<1x1x1xf32>,
    return
  }
  func.func @transform_0(%arg0: i32) -> (i32, i32, i32) {
    %c0_i32 = arith.constant 0 : i32
    %c0_i32_0 = arith.constant 0 : i32
    %c0_i32_1 = arith.constant 0 : i32
    return %arg0, %c0_i32, %c0_i32_0 : i32, i32, i32
  }
  func.func @transform_1(%arg0: i32) -> (i32, i32, i32) {
    %c0_i32 = arith.constant 0 : i32
    %c0_i32_0 = arith.constant 0 : i32
    %c0_i32_1 = arith.constant 0 : i32
    return %arg0, %c0_i32, %c0_i32_0 : i32, i32, i32
  }
  func.func @transform_2(%arg0: i32) -> (i32, i32, i32) {
    %c0_i32 = arith.constant 0 : i32
    %c0_i32_0 = arith.constant 0 : i32
    %c0_i32_1 = arith.constant 0 : i32
    return %arg0, %c0_i32, %c0_i32_0 : i32, i32, i32
  }
}

</mosaic_0001>

<bundles_post_ra>
// kernel: tpu_custom_call.1
= control target key start
LH: loop header
LB: loop body
LE: loop exit
PB: predicated region body
PF: predicated region fallthrough
CT: control target
= control target key end

     0   :  { %7 = vsyncpa [#allocation3], 0  ;;  %s928_s0 = inlined_call_operand.hbm [shape: bf16[1,16,32], index: 0, kind: input, shape index: {}]   ;;  %s929_s1 = inlined_call_operand.hbm [shape: bf16[1,16,32], index: 1, kind: input, shape index: {}]   ;;  %s930_s2 = inlined_call_operand.hbm [shape: f32[1,1,1], index: 2, kind: output, shape index: {}]  }
   0x1   :  { %8 = vsyncpa [#allocation6], 0 }
   0x2   :  { %9 = vsyncpa [#allocation4], 0  ;;  %s14_s11 = sshll.u32 %s928_s0, 4  ;;  %s669_s12 = smov [#allocation2]   ;;  %s15_s11 = int_to_ptr.hbm [resolvable:$true] %s14_s11 }
   0x3   :  { %s16_s13 = sshll.u32 %s669_s12, 4  ;;  %s27_s16 = sshll.u32 %s929_s1, 4  ;;  %s17_s13 = int_to_ptr.vmem [resolvable:$true] %s16_s13  ;;  %s28_s16 = int_to_ptr.hbm [resolvable:$true] %s27_s16 }
   0x4   :  { %s670_s17 = smov 64   ;;  %s671_s18 = smov 4  }
   0x5   :  { %22 = dma.hbm_to_vmem [thread:$0]  %s15_s11, 128, %s17_s13, [#allocation3], %s670_s17, %s670_s17, %s671_s18  }
   0x6   :  { %s672_s19 = smov [#allocation5]  }
   0x7   :  { %s29_s20 = sshll.u32 %s672_s19, 4  ;;  %s30_s20 = int_to_ptr.vmem [resolvable:$true] %s29_s20 }
   0x8   :  { %35 = dma.hbm_to_vmem [thread:$0]  %s28_s16, 128, %s30_s20, [#allocation6], %s670_s17, %s670_s17, %s671_s18  }
   0x9   :  { %663 = dma.done.wait [#allocation3], 128  }
   0xa   :  { %664 = vsyncadd [#allocation3], 4294967168 }
   0xb   :  { %665 = dma.done.wait [#allocation6], 128  }
   0xc   :  { %666 = vsyncadd [#allocation6], 4294967168  ;;  %v564_v0 = vld [vmem:[#allocation2] sm:$0xff]   ;;  %v568_v1 = vld [vmem:[#allocation5] sm:$0xff]   ;;  %s673_s0 = smov 32   ;;  %vm101_vm0 = vcmask 1047808   ;;  %v56_v18 = vlaneseq }
   0xd   :  { %v565_v2 = vunpack.c.l.bf16 %v564_v0  ;;  %v569_v3 = vunpack.c.l.bf16 %v568_v1  ;;  %v566_v5 = vunpack.c.h.bf16 %v564_v0  ;;  %v570_v6 = vunpack.c.h.bf16 %v568_v1  ;;  %s674_s1 = smov 127   ;;  %s675_s21 = smov 97  }
   0xe   :  { %v710_v19 = vshrl.u32 %v56_v18, 7  ;;  %v57_v22 = vand.u32 127, %v56_v18  ;;  %vm932_vm7 = vcmask 261120   ;;  %vm169_vm8 = vcmask 130048   ;;  %s676_s22 = smov [#allocation7]   ;;  %s546_s26 = sshll.u32 %s930_s2, 4  ;;  %s547_s26 = int_to_ptr.hbm [resolvable:$true] %s546_s26 }
   0xf   :  { %v52_v4 = vsub.f32 %v565_v2, %v569_v3  ;;  %v53_v8 = vsub.f32 %v566_v5, %v570_v6  ;;  %vm931_vm9 = vcmask 261248   ;;  %s544_s23 = sshll.u32 %s676_s22, 4  ;;  %s545_s23 = int_to_ptr.vmem [resolvable:$true] %s544_s23 }
  0x10   :  { %vm81_vm1 = vcmp.lt.s32.totalorder %v710_v19, 1  ;;  %vm75_vm2 = vcmp.eq.s32.totalorder %v710_v19, 0  ;;  %v65_v27 = vand.u32 15, %v57_v22  ;;  %vm934_vm3 = vcmp.lt.s32.totalorder %v710_v19, 7 }
  0x11   :  { %v54_v7 = vmul.f32 %v52_v4, %v52_v4  ;;  %v55_v9 = vmul.f32 %v53_v8, %v53_v8  ;;  %v726_v32 = vadd.s32 8, %v710_v19 }
  0x12   :  { %vm721_vm4 = vcmp.eq.s32.totalorder %v65_v27, 0  ;;  %vm735_vm6 = vcmp.eq.s32.totalorder %v65_v27, 15 }
  0x13   :  { %102 = vrot.lane.b32.xlu0 %v54_v7, %s673_s0  ;;  %v80_v20 = vrot.slane %v55_v9, 7  ;;  %v79_v21 = vrot.slane %v54_v7, 7  ;;  %v91_v24 = vrot.slane %v55_v9, 1  ;;  %v90_v26 = vrot.slane %v54_v7, 1 }
  0x14   :  { %vm933_vm5 = vcmp.eq.s32.totalorder %v726_v32, 15 }
  0x15   :  { %v83_v23 = vsel %vm81_vm1, %v80_v20, %v79_v21  ;;  %v93_v30 = vsel %vm934_vm3, %v90_v26, %v91_v24  ;;  %v82_v35 = vsel %vm81_vm1, %v79_v21, %v80_v20  ;;  %v94_v36 = vsel %vm934_vm3, %v91_v24, %v90_v26 }
  0x16   :  { %v88_v25 = vsel %vm75_vm2, 0.0, %v83_v23  ;;  %v137_v39 = vadd.f32 %v82_v35, %v55_v9  ;;  %v100_v41 = vsel %vm933_vm5, 0.0, %v94_v36 }
  0x17   :  { %v136_v29 = vadd.f32 %v88_v25, %v54_v7 }
  0x18   :  { %v139_v45 = vadd.f32 %v137_v39, %v100_v41 }
  0x19   :  { %v138_v33 = vadd.f32 %v136_v29, %v93_v30 }
  0x1b   :  { %105 = vrot.lane.b32.xlu0 %v55_v9, %s673_s0 }
  0x85   :  { %v103_v10 = vpop.permute.xlu0 %102 }
  0x86   :  { %v104_v11 = vsel %vm101_vm0, %v103_v10, %v54_v7 }
  0x87   :  { %108 = vrot.lane.b32.xlu1 %v104_v11, %s673_s0 }
  0x8d   :  { %v106_v12 = vpop.permute.xlu0 %105 }
  0x8e   :  { %v107_v13 = vsel %vm101_vm0, %v106_v12, %v55_v9 }
  0x8f   :  { %110 = vrot.lane.b32.xlu1 %v107_v13, %s673_s0 }
  0xf9   :  { %v109_v14 = vpop.permute.xlu1 %108 }
  0xfa   :  { %v112_v15 = vsel %vm101_vm0, %v109_v14, %v54_v7 }
  0xfb   :  { %128 = vrot.lane.b32.xlu0 %v112_v15, %s674_s1  ;;  %118 = vrot.lane.b32.xlu2 %v112_v15, %s675_s21 }
 0x101   :  { %v111_v16 = vpop.permute.xlu1 %110 }
 0x102   :  { %v113_v17 = vsel %vm101_vm0, %v111_v16, %v55_v9 }
 0x103   :  { %130 = vrot.lane.b32.xlu1 %v113_v17, %s674_s1  ;;  %120 = vrot.lane.b32.xlu2 %v113_v17, %s675_s21 }
 0x155   :  { %v119_v28 = vpop.permute.xlu2 %118 }
 0x156   :  { %v124_v34 = vsel %vm721_vm4, 0.0, %v119_v28 }
 0x157   :  { %v140_v38 = vadd.f32 %v138_v33, %v124_v34 }
 0x15d   :  { %v121_v43 = vpop.permute.xlu2 %120 }
 0x15e   :  { %v125_v46 = vsel %vm721_vm4, 0.0, %v121_v43 }
 0x15f   :  { %v141_v48 = vadd.f32 %v139_v45, %v125_v46 }
 0x16d   :  { %v129_v40 = vpop.permute.xlu0 %128 }
 0x16e   :  { %v134_v42 = vsel %vm735_vm6, 0.0, %v129_v40 }
 0x16f   :  { %v142_v44 = vadd.f32 %v140_v38, %v134_v42 }
 0x171   :  { %v144_v47 = vmul.f32 0.2, %v142_v44 }
 0x173   :  { %v557_v51 = vadd.f32 -0.5, %v144_v47 }
 0x175   :  { %v131_v49 = vpop.permute.xlu1 %130  ;;  %v747_v54 = vmax.f32 %v557_v51, 0.0 }
 0x176   :  { %v135_v50 = vsel %vm735_vm6, 0.0, %v131_v49 }
 0x177   :  { %v143_v52 = vadd.f32 %v141_v48, %v135_v50  ;;  %v151_v57 = vsel %vm932_vm7, %v747_v54, inf  ;;  %v160_v58 = vsel %vm932_vm7, %v747_v54, -inf }
 0x179   :  { %v145_v53 = vmul.f32 0.2, %v143_v52 }
 0x17b   :  { %v558_v55 = vadd.f32 -0.5, %v145_v53 }
 0x17d   :  { %v749_v56 = vmax.f32 %v558_v55, 0.0 }
 0x17f   :  { %v152_v59 = vsel %vm932_vm7, %v749_v56, inf  ;;  %v161_v60 = vsel %vm932_vm7, %v749_v56, -inf }
 0x180   :  { %v162_v61 = vmax.f32 %v160_v58, %v161_v60  ;;  %v153_v62 = vmin.f32 %v151_v57, %v152_v59 }
 0x182   :  { %v163_v63 = vrot.slane %v162_v61, 4  ;;  %v154_v0 = vrot.slane %v153_v62, 4 }
 0x184   :  { %v164_v1 = vmax.f32 %v162_v61, %v163_v63  ;;  %v155_v2 = vmin.f32 %v153_v62, %v154_v0 }
 0x186   :  { %v165_v3 = vrot.slane %v164_v1, 2  ;;  %v156_v4 = vrot.slane %v155_v2, 2 }
 0x188   :  { %v166_v5 = vmax.f32 %v164_v1, %v165_v3  ;;  %v157_v6 = vmin.f32 %v155_v2, %v156_v4 }
 0x18a   :  { %v167_v7 = vrot.slane %v166_v5, 1  ;;  %v158_v8 = vrot.slane %v157_v6, 1 }
 0x18c   :  { %v168_v9 = vmax.f32 %v166_v5, %v167_v7  ;;  %v159_v10 = vmin.f32 %v157_v6, %v158_v8 }
 0x18e   :  { %v173_v11 = vsel %vm169_vm8, %v168_v9, -inf  ;;  %v197_v12 = vsel %vm931_vm9, %v159_v10, inf  ;;  %v170_v13 = vsel %vm169_vm8, %v159_v10, inf  ;;  %v200_v14 = vsel %vm931_vm9, %v168_v9, -inf }
 0x18f   :  { %174 = vmax.xlane.f32.xlu0 %v173_v11  ;;  %198 = vmin.xlane.f32.xlu1 %v197_v12 }
 0x190   :  { %171 = vmin.xlane.f32.xlu2 %v170_v13 }
 0x198   :  { %201 = vmax.xlane.f32.xlu2 %v200_v14 }
 0x202   :  { %v175_v15 = vpop.xlane.xlu0 %174  ;;  %v199_v20 = vpop.xlane.xlu1 %198 }
 0x203   :  { %v172_v16 = vpop.xlane.xlu2 %171 }
 0x204   :  { %v176_v17 = vsub.f32 %v175_v15, %v172_v16 }
 0x206   :  { %vm177_vm10 = vcmp.ne.f32.partialorder %v176_v17, 0.0 }
 0x207   :  { %v178_v18 = vsel %vm177_vm10, %v176_v17, 1.0 }
 0x208   :  { %579 = vrcp.f32 %v178_v18  ;;  %v190_v30 = vand.u32 2147483648, %v178_v18  ;;  %vm184_vm13 = vweird.f32 %v178_v18  ;;  %v188_v33 = vand.u32 2147483647, %v178_v18 }
 0x20a   :  { %v191_v38 = vor.u32 1.1754944e-38, %v190_v30  ;;  %vm189_vm15 = vcmp.eq.f32.partialorder %v188_v33, 8.507059e+37 }
 0x20b   :  { %v202_v21 = vpop.xlane.xlu2 %201 }
 0x20c   :  { %v203_v22 = vsub.f32 %v202_v21, %v199_v20 }
 0x20e   :  { %v580_v23 = vpop.eup %579  ;;  %vm204_vm11 = vcmp.ne.f32.partialorder %v203_v22, 0.0 }
 0x20f   :  { %v180_v24 = vmul.f32 %v580_v23, %v178_v18  ;;  %v205_v25 = vsel %vm204_vm11, %v203_v22, 1.0  ;;  %vm185_vm12 = vweird.f32 %v580_v23 }
 0x210   :  { %581 = vrcp.f32 %v205_v25  ;;  %vm186_vm14 = vmor %vm184_vm13, %vm185_vm12  ;;  %v217_v39 = vand.u32 2147483648, %v205_v25  ;;  %v215_v41 = vand.u32 2147483647, %v205_v25  ;;  %vm211_vm7 = vweird.f32 %v205_v25 }
 0x211   :  { %v181_v26 = vsub.f32 1.0, %v180_v24  ;;  %vm946_vm13 = vcmask 261248  }
 0x212   :  { %v218_v44 = vor.u32 1.1754944e-38, %v217_v39  ;;  %vm216_vm3 = vcmp.eq.f32.partialorder %v215_v41, 8.507059e+37 }
 0x213   :  { %v182_v27 = vmul.f32 %v580_v23, %v181_v26 }
 0x215   :  { %v183_v28 = vadd.f32 %v580_v23, %v182_v27 }
 0x216   :  { %v582_v29 = vpop.eup %581 }
 0x217   :  { %v207_v34 = vmul.f32 %v582_v29, %v205_v25  ;;  %v187_v35 = vsel %vm186_vm14, %v580_v23, %v183_v28  ;;  %vm212_vm9 = vweird.f32 %v582_v29  ;;  %vm947_vm14 = vmmov %vm946_vm13 }
 0x218   :  { %v192_v42 = vsel %vm189_vm15, %v191_v38, %v187_v35  ;;  %vm213_vm5 = vmor %vm211_vm7, %vm212_vm9  ;;  %vm941_vm7 = vcmp.eq.s32.totalorder %v726_v32, 15  ;;  %vm942_vm9 = vcmask 261120  }
 0x219   :  { %v208_v36 = vsub.f32 1.0, %v207_v34  ;;  %v194_v45 = vmul.f32 %v192_v42, %v172_v16  ;;  %vm945_vm12 = vmmov %vm942_vm9 }
 0x21b   :  { %v209_v40 = vmul.f32 %v582_v29, %v208_v36  ;;  %v195_v51 = vsel %vm177_vm10, %v194_v45, 0.0  ;;  %vm943_vm10 = vmmov %vm942_vm9 }
 0x21d   :  { %v210_v43 = vadd.f32 %v582_v29, %v209_v40 }
 0x21f   :  { %v214_v46 = vsel %vm213_vm5, %v582_v29, %v210_v43 }
 0x220   :  { %v219_v47 = vsel %vm216_vm3, %v218_v44, %v214_v46  ;;  %vm939_vm3 = vcmp.lt.s32.totalorder %v710_v19, 7 }
 0x221   :  { %v221_v48 = vmul.f32 %v219_v47, %v199_v20  ;;  %v223_v49 = vsel %vm169_vm8, %v192_v42, %v219_v47  ;;  %vm940_vm5 = vmmov %vm939_vm3 }
 0x222   :  { %v225_v50 = vperm.slane %v223_v49, 0 }
 0x223   :  { %v222_v52 = vsel %vm204_vm11, %v221_v48, 0.0  ;;  %vm944_vm11 = vmmov %vm942_vm9 }
 0x224   :  { %v224_v53 = vsel %vm169_vm8, %v195_v51, %v222_v52  ;;  %v226_v55 = vmul.f32 %v225_v50, %v747_v54  ;;  %v227_v57 = vmul.f32 %v225_v50, %v749_v56 }
 0x225   :  { %v228_v58 = vperm.slane %v224_v53, 0 }
 0x227   :  { %v771_v59 = vsub.f32 %v226_v55, %v228_v58  ;;  %v773_v60 = vsub.f32 %v227_v57, %v228_v58 }
 0x229   :  { %258 = vrot.lane.b32.xlu0 %v773_v60, %s673_s0  ;;  %255 = vrot.lane.b32.xlu2 %v771_v59, %s673_s0  ;;  %v244_v3 = vrot.slane %v773_v60, 7  ;;  %v243_v4 = vrot.slane %v771_v59, 7  ;;  %v250_v7 = vrot.slane %v773_v60, 1  ;;  %v249_v8 = vrot.slane %v771_v59, 1 }
 0x22b   :  { %v246_v5 = vsel %vm81_vm1, %v244_v3, %v243_v4  ;;  %v251_v12 = vsel %vm939_vm3, %v249_v8, %v250_v7  ;;  %v245_v16 = vsel %vm81_vm1, %v243_v4, %v244_v3  ;;  %v252_v18 = vsel %vm940_vm5, %v250_v7, %v249_v8 }
 0x22c   :  { %v247_v6 = vsel %vm75_vm2, 0.0, %v246_v5  ;;  %v286_v21 = vadd.f32 %v245_v16, %v773_v60  ;;  %v254_v22 = vsel %vm941_vm7, 0.0, %v252_v18 }
 0x22d   :  { %v285_v10 = vadd.f32 %v247_v6, %v771_v59 }
 0x22e   :  { %v288_v26 = vadd.f32 %v286_v21, %v254_v22 }
 0x22f   :  { %v287_v14 = vadd.f32 %v285_v10, %v251_v12 }
 0x283   :  { %v256_v61 = vpop.permute.xlu2 %255 }
 0x284   :  { %v257_v62 = vsel %vm101_vm0, %v256_v61, %v771_v59 }
 0x285   :  { %261 = vrot.lane.b32.xlu1 %v257_v62, %s673_s0 }
 0x29b   :  { %v259_v54 = vpop.permute.xlu0 %258 }
 0x29c   :  { %v260_v56 = vsel %vm101_vm0, %v259_v54, %v773_v60 }
 0x29d   :  { %263 = vrot.lane.b32.xlu0 %v260_v56, %s673_s0 }
 0x2f7   :  { %v262_v63 = vpop.permute.xlu1 %261 }
 0x2f8   :  { %v265_v0 = vsel %vm101_vm0, %v262_v63, %v771_v59 }
 0x2f9   :  { %277 = vrot.lane.b32.xlu0 %v265_v0, %s674_s1  ;;  %269 = vrot.lane.b32.xlu2 %v265_v0, %s675_s21 }
 0x30f   :  { %v264_v1 = vpop.permute.xlu0 %263 }
 0x310   :  { %v266_v2 = vsel %vm101_vm0, %v264_v1, %v773_v60 }
 0x311   :  { %271 = vrot.lane.b32.xlu1 %v266_v2, %s675_s21  ;;  %279 = vrot.lane.b32.xlu2 %v266_v2, %s674_s1 }
 0x353   :  { %v270_v9 = vpop.permute.xlu2 %269 }
 0x354   :  { %v275_v13 = vsel %vm721_vm4, 0.0, %v270_v9 }
 0x355   :  { %v289_v17 = vadd.f32 %v287_v14, %v275_v13 }
 0x36b   :  { %v278_v11 = vpop.permute.xlu0 %277  ;;  %v280_v24 = vpop.permute.xlu2 %279 }
 0x36c   :  { %v283_v15 = vsel %vm735_vm6, 0.0, %v278_v11  ;;  %v284_v29 = vsel %vm735_vm6, 0.0, %v280_v24 }
 0x36d   :  { %v291_v20 = vadd.f32 %v289_v17, %v283_v15 }
 0x36f   :  { %v293_v23 = vmul.f32 0.2, %v291_v20 }
 0x371   :  { %v559_v30 = vadd.f32 -0.5, %v293_v23 }
 0x373   :  { %v819_v35 = vmax.f32 %v559_v30, 0.0 }
 0x375   :  { %v299_v39 = vsel %vm942_vm9, %v819_v35, inf  ;;  %v308_v40 = vsel %vm943_vm10, %v819_v35, -inf }
 0x383   :  { %v272_v25 = vpop.permute.xlu1 %271 }
 0x384   :  { %v276_v27 = vsel %vm721_vm4, 0.0, %v272_v25 }
 0x385   :  { %v290_v28 = vadd.f32 %v288_v26, %v276_v27 }
 0x387   :  { %v292_v33 = vadd.f32 %v290_v28, %v284_v29 }
 0x389   :  { %v294_v34 = vmul.f32 0.2, %v292_v33 }
 0x38b   :  { %v560_v36 = vadd.f32 -0.5, %v294_v34 }
 0x38d   :  { %v821_v38 = vmax.f32 %v560_v36, 0.0 }
 0x38f   :  { %v309_v41 = vsel %vm944_vm11, %v821_v38, -inf  ;;  %v300_v42 = vsel %vm945_vm12, %v821_v38, inf }
 0x390   :  { %v310_v43 = vmax.f32 %v308_v40, %v309_v41  ;;  %v301_v44 = vmin.f32 %v299_v39, %v300_v42 }
 0x392   :  { %v311_v45 = vrot.slane %v310_v43, 4  ;;  %v302_v46 = vrot.slane %v301_v44, 4 }
 0x394   :  { %v312_v47 = vmax.f32 %v310_v43, %v311_v45  ;;  %v303_v48 = vmin.f32 %v301_v44, %v302_v46 }
 0x396   :  { %v313_v49 = vrot.slane %v312_v47, 2  ;;  %v304_v50 = vrot.slane %v303_v48, 2 }
 0x398   :  { %v314_v51 = vmax.f32 %v312_v47, %v313_v49  ;;  %v305_v52 = vmin.f32 %v303_v48, %v304_v50 }
 0x39a   :  { %v315_v53 = vrot.slane %v314_v51, 1  ;;  %v306_v55 = vrot.slane %v305_v52, 1 }
 0x39c   :  { %v316_v57 = vmax.f32 %v314_v51, %v315_v53  ;;  %v307_v58 = vmin.f32 %v305_v52, %v306_v55 }
 0x39e   :  { %v320_v61 = vsel %vm169_vm8, %v316_v57, -inf  ;;  %v343_v62 = vsel %vm946_vm13, %v307_v58, inf  ;;  %v317_v54 = vsel %vm169_vm8, %v307_v58, inf  ;;  %v346_v56 = vsel %vm947_vm14, %v316_v57, -inf }
 0x39f   :  { %321 = vmax.xlane.f32.xlu0 %v320_v61  ;;  %344 = vmin.xlane.f32.xlu2 %v343_v62 }
 0x3a0   :  { %318 = vmin.xlane.f32.xlu1 %v317_v54 }
 0x3a8   :  { %347 = vmax.xlane.f32.xlu1 %v346_v56 }
 0x412   :  { %v322_v63 = vpop.xlane.xlu0 %321  ;;  %v345_v3 = vpop.xlane.xlu2 %344 }
 0x413   :  { %v319_v0 = vpop.xlane.xlu1 %318 }
 0x414   :  { %v323_v1 = vsub.f32 %v322_v63, %v319_v0 }
 0x416   :  { %vm324_vm15 = vcmp.ne.f32.partialorder %v323_v1, 0.0 }
 0x417   :  { %v325_v2 = vsel %vm324_vm15, %v323_v1, 1.0 }
 0x418   :  { %583 = vrcp.f32 %v325_v2  ;;  %v337_v13 = vand.u32 2147483648, %v325_v2  ;;  %vm331_vm7 = vweird.f32 %v325_v2  ;;  %v335_v14 = vand.u32 2147483647, %v325_v2 }
 0x41a   :  { %v338_v18 = vor.u32 1.1754944e-38, %v337_v13  ;;  %vm336_vm10 = vcmp.eq.f32.partialorder %v335_v14, 8.507059e+37 }
 0x41b   :  { %v348_v4 = vpop.xlane.xlu1 %347 }
 0x41c   :  { %v349_v5 = vsub.f32 %v348_v4, %v345_v3 }
 0x41e   :  { %v584_v6 = vpop.eup %583  ;;  %vm350_vm3 = vcmp.ne.f32.partialorder %v349_v5, 0.0 }
 0x41f   :  { %v327_v7 = vmul.f32 %v584_v6, %v325_v2  ;;  %v351_v8 = vsel %vm350_vm3, %v349_v5, 1.0  ;;  %vm332_vm5 = vweird.f32 %v584_v6 }
 0x420   :  { %585 = vrcp.f32 %v351_v8  ;;  %vm333_vm9 = vmor %vm331_vm7, %vm332_vm5  ;;  %v363_v20 = vand.u32 2147483648, %v351_v8  ;;  %v361_v22 = vand.u32 2147483647, %v351_v8  ;;  %vm357_vm12 = vweird.f32 %v351_v8 }
 0x421   :  { %v328_v9 = vsub.f32 1.0, %v327_v7 }
 0x422   :  { %v364_v25 = vor.u32 1.1754944e-38, %v363_v20  ;;  %vm362_vm14 = vcmp.eq.f32.partialorder %v361_v22, 8.507059e+37 }
 0x423   :  { %v329_v10 = vmul.f32 %v584_v6, %v328_v9 }
 0x425   :  { %v330_v11 = vadd.f32 %v584_v6, %v329_v10 }
 0x426   :  { %v586_v12 = vpop.eup %585 }
 0x427   :  { %v353_v15 = vmul.f32 %v586_v12, %v351_v8  ;;  %v334_v16 = vsel %vm333_vm9, %v584_v6, %v330_v11  ;;  %vm358_vm11 = vweird.f32 %v586_v12 }
 0x428   :  { %v339_v23 = vsel %vm336_vm10, %v338_v18, %v334_v16  ;;  %vm359_vm13 = vmor %vm357_vm12, %vm358_vm11 }
 0x429   :  { %v354_v17 = vsub.f32 1.0, %v353_v15  ;;  %v341_v26 = vmul.f32 %v339_v23, %v319_v0 }
 0x42b   :  { %v355_v21 = vmul.f32 %v586_v12, %v354_v17  ;;  %v342_v34 = vsel %vm324_vm15, %v341_v26, 0.0  ;;  %vm949_vm15 = vcmp.eq.s32.totalorder %v726_v32, 15 }
 0x42d   :  { %v356_v24 = vadd.f32 %v586_v12, %v355_v21 }
 0x42f   :  { %v360_v27 = vsel %vm359_vm13, %v586_v12, %v356_v24 }
 0x430   :  { %v365_v28 = vsel %vm362_vm14, %v364_v25, %v360_v27 }
 0x431   :  { %v367_v29 = vmul.f32 %v365_v28, %v345_v3  ;;  %v369_v30 = vsel %vm169_vm8, %v339_v23, %v365_v28 }
 0x432   :  { %v371_v33 = vperm.slane %v369_v30, 0 }
 0x433   :  { %v368_v36 = vsel %vm350_vm3, %v367_v29, 0.0 }
 0x434   :  { %v370_v39 = vsel %vm169_vm8, %v342_v34, %v368_v36  ;;  %v372_v40 = vmul.f32 %v371_v33, %v819_v35  ;;  %v373_v41 = vmul.f32 %v371_v33, %v821_v38 }
 0x435   :  { %v374_v42 = vperm.slane %v370_v39, 0 }
 0x437   :  { %v843_v43 = vsub.f32 %v372_v40, %v374_v42  ;;  %v845_v44 = vsub.f32 %v373_v41, %v374_v42 }
 0x439   :  { %405 = vrot.lane.b32.xlu2 %v845_v44, %s673_s0  ;;  %402 = vrot.lane.b32.xlu0 %v843_v43, %s673_s0  ;;  %v391_v52 = vrot.slane %v845_v44, 7  ;;  %v390_v53 = vrot.slane %v843_v43, 7  ;;  %v397_v55 = vrot.slane %v845_v44, 1  ;;  %v396_v57 = vrot.slane %v843_v43, 1 }
 0x43b   :  { %v392_v58 = vsel %vm81_vm1, %v390_v53, %v391_v52  ;;  %v393_v63 = vsel %vm81_vm1, %v391_v52, %v390_v53  ;;  %vm951_vm1 = vcmask 261120  }
 0x43c   :  { %v433_v54 = vadd.f32 %v392_v58, %v845_v44  ;;  %v394_v3 = vsel %vm75_vm2, 0.0, %v393_v63  ;;  %vm952_vm2 = vmmov %vm951_vm1 }
 0x43d   :  { %v432_v6 = vadd.f32 %v394_v3, %v843_v43  ;;  %vm954_vm5 = vmmov %vm951_vm1 }
 0x43e   :  { %vm956_vm7 = vmmov %vm951_vm1 }
 0x43f   :  { %vm957_vm9 = vmmov %vm951_vm1 }
 0x440   :  { %vm958_vm10 = vmmov %vm951_vm1 }
 0x441   :  { %vm959_vm11 = vmmov %vm951_vm1 }
 0x493   :  { %v406_v45 = vpop.permute.xlu2 %405 }
 0x494   :  { %v407_v46 = vsel %vm101_vm0, %v406_v45, %v845_v44 }
 0x495   :  { %410 = vrot.lane.b32.xlu0 %v407_v46, %s673_s0  ;;  %v377_v46 = vsel %vm956_vm7, %v843_v43, 0.0 }
 0x4ab   :  { %v403_v35 = vpop.permute.xlu0 %402 }
 0x4ac   :  { %v404_v38 = vsel %vm101_vm0, %v403_v35, %v843_v43  ;;  %v378_v35 = vsel %vm957_vm9, %v845_v44, 0.0  ;;  %vm961_vm9 = vmmov %vm956_vm7 }
 0x4ad   :  { %408 = vrot.lane.b32.xlu1 %v404_v38, %s673_s0  ;;  %v231_v38 = vsel %vm958_vm10, %v771_v59, 0.0 }
 0x507   :  { %v411_v47 = vpop.permute.xlu0 %410 }
 0x508   :  { %v413_v48 = vsel %vm101_vm0, %v411_v47, %v845_v44  ;;  %v232_v47 = vsel %vm959_vm11, %v773_v60, 0.0 }
 0x509   :  { %418 = vrot.lane.b32.xlu0 %v413_v48, %s675_s21 }
 0x51f   :  { %v409_v49 = vpop.permute.xlu1 %408 }
 0x520   :  { %v412_v50 = vsel %vm101_vm0, %v409_v49, %v843_v43  ;;  %vm948_vm0 = vcmp.lt.s32.totalorder %v710_v19, 7  ;;  %v233_v49 = vadd.f32 %v232_v47, %v231_v38 }
 0x521   :  { %424 = vrot.lane.b32.xlu1 %v412_v50, %s674_s1  ;;  %416 = vrot.lane.b32.xlu2 %v412_v50, %s675_s21  ;;  %v399_v61 = vsel %vm948_vm0, %v397_v55, %v396_v57  ;;  %vm950_vm3 = vmmov %vm948_vm0 }
 0x522   :  { %v401_v56 = vsel %vm949_vm15, 0.0, %v399_v61  ;;  %v398_v32 = vsel %vm950_vm3, %v396_v57, %v397_v55 }
 0x523   :  { %v435_v2 = vadd.f32 %v433_v54, %v401_v56  ;;  %v434_v9 = vadd.f32 %v432_v6, %v398_v32 }
 0x529   :  { %426 = vrot.lane.b32.xlu2 %v413_v48, %s674_s1  ;;  %v379_v48 = vadd.f32 %v378_v35, %v377_v46 }
 0x57b   :  { %v417_v51 = vpop.permute.xlu2 %416  ;;  %v419_v62 = vpop.permute.xlu0 %418 }
 0x57c   :  { %v423_v1 = vsel %vm721_vm4, 0.0, %v419_v62  ;;  %v422_v8 = vsel %vm721_vm4, 0.0, %v417_v51  ;;  %vm953_vm4 = vmmov %vm951_vm1 }
 0x57d   :  { %v437_v5 = vadd.f32 %v435_v2, %v423_v1  ;;  %v436_v11 = vadd.f32 %v434_v9, %v422_v8 }
 0x583   :  { %v427_v0 = vpop.permute.xlu2 %426 }
 0x584   :  { %v431_v4 = vsel %vm735_vm6, 0.0, %v427_v0 }
 0x585   :  { %v439_v7 = vadd.f32 %v437_v5, %v431_v4 }
 0x587   :  { %v441_v10 = vmul.f32 0.2, %v439_v7 }
 0x589   :  { %v562_v14 = vadd.f32 -0.5, %v441_v10 }
 0x58b   :  { %v891_v17 = vmax.f32 %v562_v14, 0.0 }
 0x58d   :  { %v447_v19 = vsel %vm951_vm1, %v891_v17, inf  ;;  %v456_v31 = vsel %vm952_vm2, %v891_v17, -inf }
 0x593   :  { %v425_v12 = vpop.permute.xlu1 %424 }
 0x594   :  { %v430_v13 = vsel %vm735_vm6, 0.0, %v425_v12  ;;  %vm955_vm6 = vcmask 261248  }
 0x595   :  { %v438_v15 = vadd.f32 %v436_v11, %v430_v13  ;;  %vm960_vm12 = vmmov %vm955_vm6 }
 0x597   :  { %v440_v16 = vmul.f32 0.2, %v438_v15 }
 0x599   :  { %v561_v18 = vadd.f32 -0.5, %v440_v16 }
 0x59b   :  { %v893_v20 = vmax.f32 %v561_v18, 0.0 }
 0x59d   :  { %v446_v21 = vsel %vm953_vm4, %v893_v20, inf  ;;  %v455_v37 = vsel %vm954_vm5, %v893_v20, -inf }
 0x59e   :  { %v457_v22 = vmax.f32 %v455_v37, %v456_v31  ;;  %v448_v23 = vmin.f32 %v446_v21, %v447_v19 }
 0x5a0   :  { %v458_v24 = vrot.slane %v457_v22, 4  ;;  %v449_v25 = vrot.slane %v448_v23, 4 }
 0x5a2   :  { %v459_v26 = vmax.f32 %v457_v22, %v458_v24  ;;  %v450_v27 = vmin.f32 %v448_v23, %v449_v25 }
 0x5a4   :  { %v460_v28 = vrot.slane %v459_v26, 2  ;;  %v451_v29 = vrot.slane %v450_v27, 2 }
 0x5a6   :  { %v461_v30 = vmax.f32 %v459_v26, %v460_v28  ;;  %v452_v33 = vmin.f32 %v450_v27, %v451_v29 }
 0x5a8   :  { %v462_v34 = vrot.slane %v461_v30, 1  ;;  %v453_v36 = vrot.slane %v452_v33, 1 }
 0x5aa   :  { %v463_v39 = vmax.f32 %v461_v30, %v462_v34  ;;  %v454_v40 = vmin.f32 %v452_v33, %v453_v36 }
 0x5ac   :  { %v467_v41 = vsel %vm169_vm8, %v463_v39, -inf  ;;  %v490_v42 = vsel %vm955_vm6, %v454_v40, inf  ;;  %v464_v45 = vsel %vm169_vm8, %v454_v40, inf  ;;  %v493_v50 = vsel %vm960_vm12, %v463_v39, -inf }
 0x5ad   :  { %468 = vmax.xlane.f32.xlu1 %v467_v41  ;;  %491 = vmin.xlane.f32.xlu2 %v490_v42 }
 0x5ae   :  { %465 = vmin.xlane.f32.xlu0 %v464_v45 }
 0x5b5   :  { %380 = vadd.xlane.f32.xlu1 %v379_v48  ;;  %234 = vadd.xlane.f32.xlu2 %v233_v49 }
 0x5b6   :  { %494 = vmax.xlane.f32.xlu0 %v493_v50 }
 0x620   :  { %v469_v51 = vpop.xlane.xlu1 %468  ;;  %v492_v44 = vpop.xlane.xlu2 %491 }
 0x621   :  { %v466_v52 = vpop.xlane.xlu0 %465 }
 0x622   :  { %v470_v53 = vsub.f32 %v469_v51, %v466_v52 }
 0x624   :  { %vm471_vm13 = vcmp.ne.f32.partialorder %v470_v53, 0.0 }
 0x625   :  { %v472_v43 = vsel %vm471_vm13, %v470_v53, 1.0 }
 0x626   :  { %587 = vrcp.f32 %v472_v43  ;;  %v484_v63 = vand.u32 2147483648, %v472_v43  ;;  %vm478_vm15 = vweird.f32 %v472_v43  ;;  %v482_v0 = vand.u32 2147483647, %v472_v43 }
 0x628   :  { %v485_v4 = vor.u32 1.1754944e-38, %v484_v63  ;;  %vm483_vm1 = vcmp.eq.f32.partialorder %v482_v0, 8.507059e+37  ;;  %v381_v27 = vpop.xlane.xlu1 %380  ;;  %v235_v29 = vpop.xlane.xlu2 %234 }
 0x629   :  { %v495_v55 = vpop.xlane.xlu0 %494  ;;  %v382_v28 = vrot.slane %v381_v27, 4  ;;  %v236_v33 = vrot.slane %v235_v29, 4 }
 0x62a   :  { %v496_v59 = vsub.f32 %v495_v55, %v492_v44 }
 0x62b   :  { %v383_v30 = vadd.f32 %v382_v28, %v381_v27  ;;  %v237_v36 = vadd.f32 %v236_v33, %v235_v29 }
 0x62c   :  { %v588_v57 = vpop.eup %587  ;;  %vm497_vm14 = vcmp.ne.f32.partialorder %v496_v59, 0.0 }
 0x62d   :  { %v474_v60 = vmul.f32 %v588_v57, %v472_v43  ;;  %v498_v58 = vsel %vm497_vm14, %v496_v59, 1.0  ;;  %vm479_vm0 = vweird.f32 %v588_v57  ;;  %v384_v34 = vrot.slane %v383_v30, 2 }
 0x62e   :  { %589 = vrcp.f32 %v498_v58  ;;  %vm480_vm3 = vmor %vm478_vm15, %vm479_vm0  ;;  %v510_v5 = vand.u32 2147483648, %v498_v58  ;;  %v508_v7 = vand.u32 2147483647, %v498_v58  ;;  %vm504_vm4 = vweird.f32 %v498_v58 }
 0x62f   :  { %v475_v61 = vsub.f32 1.0, %v474_v60  ;;  %v385_v39 = vadd.f32 %v384_v34, %v383_v30 }
 0x630   :  { %v511_v9 = vor.u32 1.1754944e-38, %v510_v5  ;;  %vm509_vm6 = vcmp.eq.f32.partialorder %v508_v7, 8.507059e+37 }
 0x631   :  { %v476_v62 = vmul.f32 %v588_v57, %v475_v61 }
 0x633   :  { %v477_v54 = vadd.f32 %v588_v57, %v476_v62 }
 0x634   :  { %v590_v56 = vpop.eup %589 }
 0x635   :  { %v500_v1 = vmul.f32 %v590_v56, %v498_v58  ;;  %v481_v2 = vsel %vm480_vm3, %v588_v57, %v477_v54  ;;  %vm505_vm2 = vweird.f32 %v590_v56 }
 0x636   :  { %v486_v32 = vsel %vm483_vm1, %v485_v4, %v481_v2  ;;  %vm506_vm5 = vmor %vm504_vm4, %vm505_vm2 }
 0x637   :  { %v501_v3 = vsub.f32 1.0, %v500_v1  ;;  %v488_v10 = vmul.f32 %v486_v32, %v466_v52 }
 0x639   :  { %v502_v6 = vmul.f32 %v590_v56, %v501_v3  ;;  %v489_v16 = vsel %vm471_vm13, %v488_v10, 0.0 }
 0x63b   :  { %v503_v8 = vadd.f32 %v590_v56, %v502_v6 }
 0x63d   :  { %v507_v11 = vsel %vm506_vm5, %v590_v56, %v503_v8 }
 0x63e   :  { %v512_v12 = vsel %vm509_vm6, %v511_v9, %v507_v11 }
 0x63f   :  { %v514_v13 = vmul.f32 %v512_v12, %v492_v44  ;;  %v516_v14 = vsel %vm169_vm8, %v486_v32, %v512_v12 }
 0x640   :  { %v518_v15 = vperm.slane %v516_v14, 0 }
 0x641   :  { %v515_v18 = vsel %vm497_vm14, %v514_v13, 0.0 }
 0x642   :  { %v517_v19 = vsel %vm169_vm8, %v489_v16, %v515_v18  ;;  %v519_v31 = vmul.f32 %v518_v15, %v893_v20  ;;  %v520_v21 = vmul.f32 %v518_v15, %v891_v17  ;;  %v238_v20 = vrot.slane %v237_v36, 2 }
 0x643   :  { %v521_v37 = vperm.slane %v517_v19, 0  ;;  %v386_v17 = vrot.slane %v385_v39, 1  ;;  %vm537_vm8 = vcmask 0  }
 0x644   :  { %v239_v42 = vadd.f32 %v238_v20, %v237_v36 }
 0x645   :  { %v522_v22 = vsub.f32 %v519_v31, %v521_v37  ;;  %v523_v23 = vsub.f32 %v520_v21, %v521_v37  ;;  %v387_v46 = vadd.f32 %v386_v17, %v385_v39 }
 0x646   :  { %v240_v38 = vrot.slane %v239_v42, 1 }
 0x647   :  { %v524_v24 = vsel %vm956_vm7, %v522_v22, 0.0  ;;  %v525_v25 = vsel %vm961_vm9, %v523_v23, 0.0  ;;  %v388_v48 = vmul.f32 4.0, %v387_v46 }
 0x648   :  { %v526_v26 = vadd.f32 %v525_v25, %v524_v24  ;;  %v241_v50 = vadd.f32 %v240_v38, %v239_v42 }
 0x64a   :  { %527 = vadd.xlane.f32.xlu0 %v526_v26  ;;  %v389_v52 = vadd.f32 %v388_v48, %v241_v50 }
 0x6bd   :  { %v528_v40 = vpop.xlane.xlu0 %527 }
 0x6be   :  { %v529_v41 = vrot.slane %v528_v40, 4 }
 0x6c0   :  { %v530_v45 = vadd.f32 %v529_v41, %v528_v40 }
 0x6c2   :  { %v531_v35 = vrot.slane %v530_v45, 2 }
 0x6c4   :  { %v532_v47 = vadd.f32 %v531_v35, %v530_v45 }
 0x6c6   :  { %v533_v49 = vrot.slane %v532_v47, 1 }
 0x6c8   :  { %v534_v51 = vadd.f32 %v533_v49, %v532_v47 }
 0x6ca   :  { %v535_v53 = vmul.f32 9.0, %v534_v51 }
 0x6cc   :  { %v536_v43 = vadd.f32 %v535_v53, %v389_v52 }
 0x6ce   :  { %538 = vst.msk [vmem:[#allocation7] sm:$0x1] %vm537_vm8, %v536_v43 }
 0x6cf   :  { %549 = dma.vmem_to_hbm [thread:$0]  %s545_s23, 16, %s547_s26, [#allocation4]  }
 0x6d0   :  { %667 = dma.done.wait [#allocation4], 16  }
 0x6d1   :  { %668 = vsyncadd [#allocation4], 4294967280 }
 0x6d2   :  { %554 = vsyncpa [#allocation3], 1 }
 0x6d3   :  { %555 = vsyncpa [#allocation6], 1 }
 0x6d4   :  { %556 = vsyncpa [#allocation4], 1 }

</bundles_post_ra>
